<compile_context>
chip_gen: v6e
topology: v6e:2x2x1
jax: 0.10.0
libtpu: 0.0.40
codegen_flags: <defaults>
</compile_context>

<pallas_src>
import jax
import jax.numpy as jnp
from jax.experimental import pallas as pl
from jax.experimental.pallas import tpu as pltpu


def _linear_kernel(x_ref, w_ref, b_ref, o_ref):
    # x_ref: (TM, D_in) bf16   w_ref: (D_in, N_pad) bf16
    # b_ref: (1, N_pad) f32    o_ref: (TM, N_pad) f32
    acc = jnp.dot(x_ref[...], w_ref[...], preferred_element_type=jnp.float32)
    o_ref[...] = (acc + b_ref[...]).astype(o_ref.dtype)


def _round_up(x, m):
    return ((x + m - 1) // m) * m


def logistic_regression_forward(x, w_t, b, *, compute_dtype=jnp.bfloat16):
    """x: (B, C, H, W) f32, w_t: (D_in, D_out) == PyTorch weight^T, b: (D_out,).
    Returns f32 logits of shape (B, D_out)."""
    B = x.shape[0]
    d_in, d_out = w_t.shape
    x_flat = x.reshape(B, -1)                       # NCHW -> (B, C*H*W) flatten glue
    assert x_flat.shape[1] == d_in

    LANE, SUBLANE = 128, 8
    n_pad = _round_up(d_out, LANE)                  # lane-dense output
    # batch tile: big enough to pipeline at real batch sizes, clamped for tiny B
    tm_target = 512 if compute_dtype == jnp.bfloat16 else 256
    tm = min(tm_target, _round_up(B, SUBLANE))
    b_pad = _round_up(B, tm)

    # memory-bound layer: narrow inputs/weights, f32 accumulation in the kernel
    x_c = x_flat.astype(compute_dtype)
    w_c = w_t.astype(compute_dtype)
    if b_pad != B:
        x_c = jnp.pad(x_c, ((0, b_pad - B), (0, 0)))
    w_p = jnp.pad(w_c, ((0, 0), (0, n_pad - d_out))) if n_pad != d_out else w_c
    b_p = jnp.pad(b, (0, n_pad - d_out)) if n_pad != d_out else b
    b2d = b_p.reshape(1, n_pad).astype(jnp.float32)

    grid = (b_pad // tm,)

    cost = pl.CostEstimate(
        flops=2 * b_pad * d_in * n_pad,
        bytes_accessed=(x_c.size * x_c.dtype.itemsize
                        + w_p.size * w_p.dtype.itemsize
                        + b2d.size * 4
                        + b_pad * n_pad * 4),
        transcendentals=0,
    )

    out = pl.pallas_call(
        _linear_kernel,
        out_shape=jax.ShapeDtypeStruct((b_pad, n_pad), jnp.float32),
        grid=grid,
        in_specs=[
            pl.BlockSpec((tm, d_in), lambda i: (i, 0)),     # batch-tiled activations
            pl.BlockSpec((d_in, n_pad), lambda i: (0, 0)),  # weight resident in VMEM
            pl.BlockSpec((1, n_pad), lambda i: (0, 0)),     # bias resident in VMEM
        ],
        out_specs=pl.BlockSpec((tm, n_pad), lambda i: (i, 0)),
        compiler_params=pltpu.CompilerParams(
            dimension_semantics=("parallel",),              # 2 TCs on v7x
        ),
        cost_estimate=cost,
    )(x_c, w_p, b2d)

    return out[:B, :d_out]                                  # strip padding


if __name__ == "__main__":
    # batch=2, channels=4, spatial=16x16  -> dim_in = 4*16*16 = 1024, dim_out = 10
    B, C, H, W = 2, 4, 16, 16
    dim_in = C * H * W
    dim_out = 10

    key = jax.random.PRNGKey(0)
    kx, kw, kb = jax.random.split(key, 3)

    x = jax.random.normal(kx, (B, C, H, W), dtype=jnp.float32)

    # PyTorch Linear init: U(-1/sqrt(dim_in), +1/sqrt(dim_in)); weight stored as W^T
    bound = 1.0 / jnp.sqrt(jnp.float32(dim_in))
    w_t = jax.random.uniform(kw, (dim_in, dim_out), minval=-bound, maxval=bound,
                             dtype=jnp.float32)
    b = jax.random.uniform(kb, (dim_out,), minval=-bound, maxval=bound,
                           dtype=jnp.float32)

    out = logistic_regression_forward(x, w_t, b)
    out = jax.block_until_ready(out)
    assert out.shape == (B, dim_out)
    assert out.dtype == jnp.float32

    # Reference check: exact-ish vs bf16-rounded inputs (what the kernel computes),
    # loose vs the full-f32 PyTorch-equivalent logits.
    x_flat = x.reshape(B, -1)
    ref_bf16 = (x_flat.astype(jnp.bfloat16).astype(jnp.float32)
                @ w_t.astype(jnp.bfloat16).astype(jnp.float32)) + b
    ref_f32 = x_flat @ w_t + b
    assert jnp.allclose(out, ref_bf16, atol=1e-3, rtol=1e-3)
    assert jnp.allclose(out, ref_f32, atol=5e-2, rtol=5e-2)

    print("KERNEL_OK")
</pallas_src>

<mosaic_0001>
module attributes {stable_mosaic.version = 11 : i64} {
  func.func @_linear_kernel(%arg0: i32, %arg1: memref<8x1024xbf16, #tpu.memory_space<vmem>>, %arg2: memref<1024x128xbf16, #tpu.memory_space<vmem>>, %arg3: memref<1x128xf32, #tpu.memory_space<vmem>>, %arg4: memref<8x128xf32, #tpu.memory_space<vmem>>) attributes {dimension_semantics = [#tpu.dimension_semantics<parallel>], iteration_bounds = array<i64: 1>, scalar_prefetch = 0 : i64, scratch_operands = 0 : i64, tpu.core_type = #tpu.core_type<tc>, window_params = [{transform_indices = @transform_0, window_bounds = array<i64: 8, 1024>}, {pipeline_mode = #tpu.pipeline_mode<synchronous>, transform_indices = @transform_1, window_bounds = array<i64: 1024, 128>}, {pipeline_mode = #tpu.pipeline_mode<synchronous>, transform_indices = @transform_2, window_bounds = array<i64: 1, 128>}, {transform_indices = @transform_3, window_bounds = array<i64: 8, 128>}]} {
    %c0 = arith.constant 0 : index
    %c0_0 = arith.constant 0 : index
    %0 = vector.load %arg1[%c0, %c0_0] : memref<8x1024xbf16, #tpu.memory_space<vmem>>, vector<8x1024xbf16>
    %c0_1 = arith.constant 0 : index
    %c0_2 = arith.constant 0 : index
    %1 = vector.load %arg2[%c0_1, %c0_2] : memref<1024x128xbf16, #tpu.memory_space<vmem>>, vector<1024x128xbf16>
    %cst = arith.constant dense<0.000000e+00> : vector<8x128xf32>
    %2 = tpu.matmul %0, %1, %cst {dimension_numbers = #tpu.dot_dimension_numbers<[1], [0], [0], [1], [0, 0, 1, 1], [], []>} : vector<8x1024xbf16>, vector<1024x128xbf16>, vector<8x128xf32> -> vector<8x128xf32>
    %c0_3 = arith.constant 0 : index
    %c0_4 = arith.constant 0 : index
    %3 = vector.load %arg3[%c0_3, %c0_4] : memref<1x128xf32, #tpu.memory_space<vmem>>, vector<1x128xf32>
    %4 = vector.broadcast %3 : vector<1x128xf32> to vector<8x128xf32>
    %5 = arith.addf %2, %4 : vector<8x128xf32>
    %c0_5 = arith.constant 0 : index
    %c0_6 = arith.constant 0 : index
    %6 = vector.load %arg4[%c0_5, %c0_6] : memref<8x128xf32, #tpu.memory_space<vmem>>, vector<8x128xf32>
    tpu.vector_store %arg4[%c0_5, %c0_6], %5 {strides = array<i32>} : memref<8x128xf32, #tpu.memory_space<vmem>>, vector<8x128xf32>,
    return
  }
  func.func @transform_0(%arg0: i32) -> (i32, i32) {
    %c0_i32 = arith.constant 0 : i32
    %c0_i32_0 = arith.constant 0 : i32
    return %arg0, %c0_i32 : i32, i32
  }
  func.func @transform_1(%arg0: i32) -> (i32, i32) {
    %c0_i32 = arith.constant 0 : i32
    %c0_i32_0 = arith.constant 0 : i32
    %c0_i32_1 = arith.constant 0 : i32
    return %c0_i32, %c0_i32_0 : i32, i32
  }
  func.func @transform_2(%arg0: i32) -> (i32, i32) {
    %c0_i32 = arith.constant 0 : i32
    %c0_i32_0 = arith.constant 0 : i32
    %c0_i32_1 = arith.constant 0 : i32
    return %c0_i32, %c0_i32_0 : i32, i32
  }
  func.func @transform_3(%arg0: i32) -> (i32, i32) {
    %c0_i32 = arith.constant 0 : i32
    %c0_i32_0 = arith.constant 0 : i32
    return %arg0, %c0_i32 : i32, i32
  }
}

</mosaic_0001>

<bundles_post_ra>
// kernel: tpu_custom_call.1
= control target key start
LH: loop header
LB: loop body
LE: loop exit
PB: predicated region body
PF: predicated region fallthrough
CT: control target
= control target key end

     0   :  { %8 = vsyncpa [#allocation3], 0  ;;  %s1111_s0 = inlined_call_operand.hbm [shape: bf16[8,1024], index: 0, kind: input, shape index: {}]   ;;  %s1112_s1 = inlined_call_operand.hbm [shape: bf16[1024,128], index: 1, kind: input, shape index: {}]   ;;  %s1113_s2 = inlined_call_operand.vmem [shape: f32[1,128], index: 2, kind: input, shape index: {}]   ;;  %s1114_s3 = inlined_call_operand.hbm [shape: f32[8,128], index: 3, kind: output, shape index: {}]  }
   0x1   :  { %9 = vsyncpa [#allocation6], 0 }
   0x2   :  { %10 = vsyncpa [#allocation4], 0  ;;  %s1074_s12 = smov [#allocation2]   ;;  %s1075_s14 = smov [#allocation5]  }
   0x3   :  { %s17_s13 = sshll.u32 %s1074_s12, 4  ;;  %s26_s15 = sshll.u32 %s1075_s14, 4  ;;  %s18_s13 = int_to_ptr.vmem [resolvable:$true] %s17_s13  ;;  %s27_s15 = int_to_ptr.vmem [resolvable:$true] %s26_s15 }
   0x4   :  { %s1016_s16 = scalar_lea.vmem %s18_s13, 512  ;;  %p1021_p1 = scmp.lt.s32.totalorder %s18_s13, %s18_s13 }
   0x5   :  { %p1017_p0 = scmp.ne.s32.totalorder %s18_s13, %s1016_s16  ;;  %p1022_p2 = scmp.lt.s32.totalorder %s1016_s16, %s1016_s16 }
   0x7   :  { %p1023_p3 = por %p1022_p2, %p1021_p1 }
   0x9   :  { %p1024_p4 = pnand %p1023_p3, %p1017_p0 }
   0xb   :  { %1027 = shalt.err (!%p1024_p4)
}
   0xc   :  { %20 = dma.hbm_to_vmem [thread:$0]  %s1111_s0, 512, %s18_s13, [#allocation3]  }
   0xd   :  { %s1036_s19 = scalar_lea.vmem %s27_s15, 8192  ;;  %p1041_p6 = scmp.lt.s32.totalorder %s27_s15, %s27_s15 }
   0xe   :  { %p1037_p5 = scmp.ne.s32.totalorder %s27_s15, %s1036_s19  ;;  %p1042_p7 = scmp.lt.s32.totalorder %s1036_s19, %s1036_s19 }
  0x10   :  { %p1043_p8 = por %p1042_p7, %p1041_p6 }
  0x12   :  { %p1044_p9 = pnand %p1043_p8, %p1037_p5 }
  0x14   :  { %1047 = shalt.err (!%p1044_p9)
}
  0x15   :  { %s1076_s20 = smov 64   ;;  %s1077_s21 = smov 4  }
  0x16   :  { %32 = dma.hbm_to_vmem [thread:$0]  %s1112_s1, 8192, %s27_s15, [#allocation6], %s1076_s20, %s1076_s20, %s1077_s21  }
  0x17   :  { %1068 = dma.done.wait [#allocation3], 512  }
  0x18   :  { %1069 = vsyncadd [#allocation3], 4294966784 }
  0x19   :  { %1070 = dma.done.wait [#allocation6], 8192  }
  0x1a   :  { %1071 = vsyncadd [#allocation6], 4294959104  ;;  %v936_v0 = vld [vmem:[#allocation5 + $0x78] sm:$0xff]   ;;  %v940_v4 = vld [vmem:[#allocation5 + $0x70] sm:$0xff]   ;;  %s1078_s24 = smov [#allocation7]  }
  0x1b   :  { %v937_v1 = vld [vmem:[#allocation5 + $0xf8] sm:$0xff]   ;;  %843 = vmatprep.subr.bf16.mxu0 %v936_v0  ;;  %v941_v5 = vld [vmem:[#allocation5 + $0xf0] sm:$0xff]   ;;  %v944_v8 = vld [vmem:[#allocation5 + $0x68] sm:$0xff]   ;;  %s760_s25 = sshll.u32 %s1078_s24, 4  ;;  %s761_s25 = int_to_ptr.vmem [resolvable:$true] %s760_s25 }
  0x1c   :  { %v938_v2 = vld [vmem:[#allocation5 + $0x38] sm:$0xff]   ;;  %865 = vmatprep.subr.bf16.mxu1 %v937_v1  ;;  %v942_v6 = vld [vmem:[#allocation5 + $0x30] sm:$0xff]   ;;  %v945_v9 = vld [vmem:[#allocation5 + $0xe8] sm:$0xff]   ;;  %p1053_p11 = scmp.lt.s32.totalorder %s761_s25, %s761_s25 }
  0x1d   :  { %v939_v3 = vld [vmem:[#allocation5 + $0xb8] sm:$0xff]   ;;  %844 = vmatpush3.bf16.msra.mxu0 %v938_v2  ;;  %v943_v7 = vld [vmem:[#allocation5 + $0xb0] sm:$0xff]   ;;  %v946_v10 = vld [vmem:[#allocation5 + $0x28] sm:$0xff]  }
  0x1e   :  { %866 = vmatpush3.bf16.msra.mxu1 %v939_v3  ;;  %845 = vmatprep.subr.bf16.mxu0 %v940_v4  ;;  %v947_v11 = vld [vmem:[#allocation5 + $0xa8] sm:$0xff]   ;;  %v948_v12 = vld [vmem:[#allocation5 + $0x60] sm:$0xff]   ;;  %v952_v16 = vld [vmem:[#allocation5 + $0x58] sm:$0xff]  }
  0x1f   :  { %867 = vmatprep.subr.bf16.mxu1 %v941_v5  ;;  %v949_v13 = vld [vmem:[#allocation5 + $0xe0] sm:$0xff]   ;;  %v953_v17 = vld [vmem:[#allocation5 + $0xd8] sm:$0xff]   ;;  %v956_v20 = vld [vmem:[#allocation5 + $0x50] sm:$0xff]  }
  0x20   :  { %v950_v14 = vld [vmem:[#allocation5 + $0x20] sm:$0xff]   ;;  %v954_v18 = vld [vmem:[#allocation5 + $0x18] sm:$0xff]   ;;  %v957_v21 = vld [vmem:[#allocation5 + $0xd0] sm:$0xff]  }
  0x21   :  { %846 = vmatpush3.bf16.msra.mxu0 %v942_v6  ;;  %v951_v15 = vld [vmem:[#allocation5 + $0xa0] sm:$0xff]   ;;  %v955_v19 = vld [vmem:[#allocation5 + $0x98] sm:$0xff]   ;;  %v958_v22 = vld [vmem:[#allocation5 + $0x10] sm:$0xff]  }
  0x22   :  { %868 = vmatpush3.bf16.msra.mxu1 %v943_v7  ;;  %847 = vmatprep.subr.bf16.mxu0 %v944_v8  ;;  %v959_v23 = vld [vmem:[#allocation5 + $0x90] sm:$0xff]   ;;  %v960_v24 = vld [vmem:[#allocation5 + $0x48] sm:$0xff]   ;;  %v964_v28 = vld [vmem:[#allocation5 + $0x40] sm:$0xff]  }
  0x23   :  { %869 = vmatprep.subr.bf16.mxu1 %v945_v9  ;;  %v961_v25 = vld [vmem:[#allocation5 + $0xc8] sm:$0xff]   ;;  %v965_v29 = vld [vmem:[#allocation5 + $0xc0] sm:$0xff]   ;;  %v972_v38 = vld [vmem:[#allocation5 + $0x178] sm:$0xff]  }
  0x24   :  { %v962_v26 = vld [vmem:[#allocation5 + $0x8] sm:$0xff]   ;;  %v966_v30 = vld [vmem:[#allocation5] sm:$0xff]   ;;  %v973_v39 = vld [vmem:[#allocation5 + $0x1f8] sm:$0xff]  }
  0x25   :  { %848 = vmatpush3.bf16.msra.mxu0 %v946_v10  ;;  %v963_v27 = vld [vmem:[#allocation5 + $0x88] sm:$0xff]   ;;  %v967_v31 = vld [vmem:[#allocation5 + $0x80] sm:$0xff]   ;;  %v974_v40 = vld [vmem:[#allocation5 + $0x138] sm:$0xff]  }
  0x26   :  { %870 = vmatpush3.bf16.msra.mxu1 %v947_v11  ;;  %849 = vmatprep.subr.bf16.mxu0 %v948_v12  ;;  %v42_v32 = vld [vmem:[#allocation2] sm:$0xff]  ;;  %v43_v33 = vld [vmem:[#allocation2 + $0x8] sm:$0xff]  ;;  %v975_v41 = vld [vmem:[#allocation5 + $0x1b8] sm:$0xff]  }
  0x27   :  { %871 = vmatprep.subr.bf16.mxu1 %v949_v13  ;;  %v771_v34 = vcombine.low %v42_v32, %v42_v32  ;;  %v772_v35 = vcombine.high %v42_v32, %v42_v32  ;;  %v773_v36 = vcombine.low %v43_v33, %v43_v33  ;;  %v774_v37 = vcombine.high %v43_v33, %v43_v33  ;;  %v976_v42 = vld [vmem:[#allocation5 + $0x170] sm:$0xff]   ;;  %v980_v46 = vld [vmem:[#allocation5 + $0x168] sm:$0xff]   ;;  %v984_v50 = vld [vmem:[#allocation5 + $0x160] sm:$0xff]  }
  0x28   :  { %v977_v43 = vld [vmem:[#allocation5 + $0x1f0] sm:$0xff]   ;;  %v981_v47 = vld [vmem:[#allocation5 + $0x1e8] sm:$0xff]   ;;  %v985_v51 = vld [vmem:[#allocation5 + $0x1e0] sm:$0xff]  }
  0x29   :  { %850 = vmatpush3.bf16.msra.mxu0 %v950_v14  ;;  %625 = vmatprep.mubr.bf16.mxu0 %v772_v35  ;;  %v978_v44 = vld [vmem:[#allocation5 + $0x130] sm:$0xff]   ;;  %v982_v48 = vld [vmem:[#allocation5 + $0x128] sm:$0xff]   ;;  %v986_v52 = vld [vmem:[#allocation5 + $0x120] sm:$0xff]  }
  0x2a   :  { %872 = vmatpush3.bf16.msra.mxu1 %v951_v15  ;;  %851 = vmatprep.subr.bf16.mxu0 %v952_v16  ;;  %v979_v45 = vld [vmem:[#allocation5 + $0x1b0] sm:$0xff]   ;;  %v983_v49 = vld [vmem:[#allocation5 + $0x1a8] sm:$0xff]   ;;  %v987_v53 = vld [vmem:[#allocation5 + $0x1a0] sm:$0xff]  }
  0x2b   :  { %873 = vmatprep.subr.bf16.mxu1 %v953_v17  ;;  %665 = vmatprep.mubr.bf16.mxu1 %v774_v37  ;;  %v988_v54 = vld [vmem:[#allocation5 + $0x158] sm:$0xff]   ;;  %v992_v58 = vld [vmem:[#allocation5 + $0x150] sm:$0xff]   ;;  %v996_v62 = vld [vmem:[#allocation5 + $0x148] sm:$0xff]  }
  0x2c   :  { %v989_v55 = vld [vmem:[#allocation5 + $0x1d8] sm:$0xff]   ;;  %v993_v59 = vld [vmem:[#allocation5 + $0x1d0] sm:$0xff]   ;;  %v997_v63 = vld [vmem:[#allocation5 + $0x1c8] sm:$0xff]  }
  0x2d   :  { %852 = vmatpush3.bf16.msra.mxu0 %v954_v18  ;;  %v990_v56 = vld [vmem:[#allocation5 + $0x118] sm:$0xff]   ;;  %v994_v60 = vld [vmem:[#allocation5 + $0x110] sm:$0xff]   ;;  %v998_v0 = vld [vmem:[#allocation5 + $0x108] sm:$0xff]  }
  0x2e   :  { %874 = vmatpush3.bf16.msra.mxu1 %v955_v19  ;;  %853 = vmatprep.subr.bf16.mxu0 %v956_v20  ;;  %v991_v57 = vld [vmem:[#allocation5 + $0x198] sm:$0xff]   ;;  %v995_v61 = vld [vmem:[#allocation5 + $0x190] sm:$0xff]   ;;  %v999_v1 = vld [vmem:[#allocation5 + $0x188] sm:$0xff]  }
  0x2f   :  { %875 = vmatprep.subr.bf16.mxu1 %v957_v21  ;;  %v1000_v2 = vld [vmem:[#allocation5 + $0x140] sm:$0xff]   ;;  %v44_v6 = vld [vmem:[#allocation2 + $0x10] sm:$0xff]  ;;  %v45_v9 = vld [vmem:[#allocation2 + $0x18] sm:$0xff] }
  0x30   :  { %v1001_v3 = vld [vmem:[#allocation5 + $0x1c0] sm:$0xff]   ;;  %v775_v7 = vcombine.low %v44_v6, %v44_v6  ;;  %v776_v8 = vcombine.high %v44_v6, %v44_v6  ;;  %v777_v10 = vcombine.low %v45_v9, %v45_v9  ;;  %v778_v11 = vcombine.high %v45_v9, %v45_v9 }
  0x31   :  { %854 = vmatpush3.bf16.msra.mxu0 %v958_v22  ;;  %v1002_v4 = vld [vmem:[#allocation5 + $0x100] sm:$0xff]  }
  0x32   :  { %876 = vmatpush3.bf16.msra.mxu1 %v959_v23  ;;  %855 = vmatprep.subr.bf16.mxu0 %v960_v24  ;;  %v1003_v5 = vld [vmem:[#allocation5 + $0x180] sm:$0xff]  }
  0x33   :  { %877 = vmatprep.subr.bf16.mxu1 %v961_v25  ;;  %v770_v21 = vld [vmem:[%s1113_s2] ss:$0 sm:$0xff]  ;;  %s1048_s2 = scalar_lea.vmem %s761_s25, 128 }
  0x34   :  { %p1049_p10 = scmp.ne.s32.totalorder %s761_s25, %s1048_s2  ;;  %p1054_p12 = scmp.lt.s32.totalorder %s1048_s2, %s1048_s2 }
  0x35   :  { %856 = vmatpush3.bf16.msra.mxu0 %v962_v26 }
  0x36   :  { %878 = vmatpush3.bf16.msra.mxu1 %v963_v27  ;;  %857 = vmatprep.subr.bf16.mxu0 %v964_v28  ;;  %p1055_p13 = por %p1054_p12, %p1053_p11 }
  0x37   :  { %879 = vmatprep.subr.bf16.mxu1 %v965_v29 }
  0x38   :  { %p1056_p0 = pnand %p1055_p13, %p1049_p10 }
  0x39   :  { %858 = vmatpush3.bf16.msra.mxu0 %v966_v30 }
  0x3a   :  { %880 = vmatpush3.bf16.msra.mxu1 %v967_v31  ;;  %887 = vmatprep.subr.bf16.mxu0 %v972_v38 }
  0x3b   :  { %909 = vmatprep.subr.bf16.mxu1 %v973_v39 }
  0x3c   :  { %626 = vmatmul.mubr.bf16.vlgmr.msra.gmra.mxu0 %v771_v34 }
  0x3d   :  { %666 = vmatmul.mubr.bf16.vlgmr.msra.gmra.mxu1 %v773_v36  ;;  %888 = vmatpush3.bf16.msra.mxu0 %v974_v40 }
  0x3e   :  { %910 = vmatpush3.bf16.msra.mxu1 %v975_v41  ;;  %889 = vmatprep.subr.bf16.mxu0 %v976_v42 }
  0x3f   :  { %911 = vmatprep.subr.bf16.mxu1 %v977_v43  ;;  %705 = vmatprep.mubr.bf16.mxu0 %v776_v8 }
  0x40   :  { %745 = vmatprep.mubr.bf16.mxu1 %v778_v11 }
  0x41   :  { %890 = vmatpush3.bf16.msra.mxu0 %v978_v44 }
  0x42   :  { %912 = vmatpush3.bf16.msra.mxu1 %v979_v45  ;;  %891 = vmatprep.subr.bf16.mxu0 %v980_v46 }
  0x43   :  { %913 = vmatprep.subr.bf16.mxu1 %v981_v47 }
  0x45   :  { %892 = vmatpush3.bf16.msra.mxu0 %v982_v48 }
  0x46   :  { %914 = vmatpush3.bf16.msra.mxu1 %v983_v49  ;;  %893 = vmatprep.subr.bf16.mxu0 %v984_v50 }
  0x47   :  { %915 = vmatprep.subr.bf16.mxu1 %v985_v51 }
  0x49   :  { %894 = vmatpush3.bf16.msra.mxu0 %v986_v52 }
  0x4a   :  { %916 = vmatpush3.bf16.msra.mxu1 %v987_v53  ;;  %895 = vmatprep.subr.bf16.mxu0 %v988_v54 }
  0x4b   :  { %917 = vmatprep.subr.bf16.mxu1 %v989_v55 }
  0x4d   :  { %896 = vmatpush3.bf16.msra.mxu0 %v990_v56 }
  0x4e   :  { %918 = vmatpush3.bf16.msra.mxu1 %v991_v57  ;;  %897 = vmatprep.subr.bf16.mxu0 %v992_v58 }
  0x4f   :  { %919 = vmatprep.subr.bf16.mxu1 %v993_v59 }
  0x51   :  { %898 = vmatpush3.bf16.msra.mxu0 %v994_v60 }
  0x52   :  { %920 = vmatpush3.bf16.msra.mxu1 %v995_v61  ;;  %899 = vmatprep.subr.bf16.mxu0 %v996_v62 }
  0x53   :  { %921 = vmatprep.subr.bf16.mxu1 %v997_v63 }
  0x55   :  { %900 = vmatpush3.bf16.msra.mxu0 %v998_v0 }
  0x56   :  { %922 = vmatpush3.bf16.msra.mxu1 %v999_v1  ;;  %901 = vmatprep.subr.bf16.mxu0 %v1000_v2 }
  0x57   :  { %923 = vmatprep.subr.bf16.mxu1 %v1001_v3 }
  0x59   :  { %902 = vmatpush3.bf16.msra.mxu0 %v1002_v4 }
  0x5a   :  { %924 = vmatpush3.bf16.msra.mxu1 %v1003_v5 }
  0x5c   :  { %706 = vmatmul.mubr.bf16.vlgmr.msra.gmra.mxu0 %v775_v7 }
  0x5d   :  { %746 = vmatmul.mubr.bf16.vlgmr.msra.gmra.mxu1 %v777_v10 }
  0xfc   :  { %v859_v12 = vpop.f32.mrf.mxu0 }
  0xfd   :  { %v881_v13 = vpop.f32.mrf.mxu1 }
  0xfe   :  { %v860_v14 = vpop.f32.mrf.mxu0 }
  0xff   :  { %v882_v15 = vpop.f32.mrf.mxu1  ;;  %v861_v20 = vadd.f32 %v860_v14, %v859_v12 }
 0x100   :  { %v862_v16 = vpop.f32.mrf.mxu0  ;;  %v883_v23 = vadd.f32 %v882_v15, %v881_v13 }
 0x101   :  { %v884_v17 = vpop.f32.mrf.mxu1  ;;  %v628_v22 = vadd.f32 %v861_v20, %v770_v21 }
 0x102   :  { %v863_v18 = vpop.f32.mrf.mxu0 }
 0x103   :  { %v885_v19 = vpop.f32.mrf.mxu1  ;;  %v668_v28 = vadd.f32 %v883_v23, %v628_v22 }
 0x11c   :  { %v903_v24 = vpop.f32.mrf.mxu0 }
 0x11d   :  { %v925_v25 = vpop.f32.mrf.mxu1 }
 0x11e   :  { %v904_v26 = vpop.f32.mrf.mxu0 }
 0x11f   :  { %v926_v27 = vpop.f32.mrf.mxu1  ;;  %v905_v29 = vadd.f32 %v904_v26, %v903_v24 }
 0x120   :  { %v906_v30 = vpop.f32.mrf.mxu0  ;;  %v927_v33 = vadd.f32 %v926_v27, %v925_v25 }
 0x121   :  { %v928_v31 = vpop.f32.mrf.mxu1  ;;  %v708_v32 = vadd.f32 %v905_v29, %v668_v28 }
 0x122   :  { %v907_v34 = vpop.f32.mrf.mxu0 }
 0x123   :  { %v929_v35 = vpop.f32.mrf.mxu1  ;;  %v748_v36 = vadd.f32 %v927_v33, %v708_v32 }
 0x125   :  { %753 = vst [vmem:[#allocation7] sm:$0xff] %v748_v36 }
 0x126   :  { %1059 = shalt.err (!%p1056_p0)
}
 0x127   :  { %763 = dma.vmem_to_hbm [thread:$0]  %s761_s25, 128, %s1114_s3, [#allocation4]  }
 0x128   :  { %1072 = dma.done.wait [#allocation4], 128  }
 0x129   :  { %1073 = vsyncadd [#allocation4], 4294967168 }
 0x12a   :  { %767 = vsyncpa [#allocation3], 1 }
 0x12b   :  { %768 = vsyncpa [#allocation6], 1 }
 0x12c   :  { %769 = vsyncpa [#allocation4], 1 }

</bundles_post_ra>
